<compile_context>
chip_gen: v5e
topology: v5e:2x2
jax: 0.10.0
libtpu: 0.0.40
codegen_flags: <defaults>
</compile_context>

<pallas_src>
import functools

import jax
import jax.numpy as jnp
from jax.experimental import pallas as pl
from jax.experimental.pallas import tpu as pltpu


def _round_up(x, m):
    return (x + m - 1) // m * m


def _lossp_kernel(gout_ref, fout_ref, y_ref, w_ref, out_ref, *, lam, n_rows, row_tile):
    g = gout_ref[...].astype(jnp.float32)            # (row_tile, D)
    f = fout_ref[...].astype(jnp.float32)            # (row_tile, C)
    t = y_ref[...].astype(jnp.float32)               # (row_tile, C)
    w = w_ref[...].astype(jnp.float32)               # (row_tile, 1)

    # per-row inner product over the class axis (dim=1 in the torch code)
    p = jnp.sum(f * t, axis=1, keepdims=True)        # (row_tile, 1)

    # Mask the ragged last tile (only traced in when N % row_tile != 0).
    if n_rows % row_tile != 0:
        base = pl.program_id(0) * row_tile
        row_ids = base + jax.lax.broadcasted_iota(jnp.int32, (row_tile, 1), 0)
        valid = row_ids < n_rows
        g = jnp.where(valid, g, 0.0)                 # padded rows contribute 0
        p = jnp.where(valid, p, 1.0)                 # log(1) = 0
        w = jnp.where(valid, w, 0.0)

    lossq_part = -lam * jnp.sum(g * g)               # VPU multiply-add, no MXU
    main_part = jnp.sum(w * jnp.log(p))
    partial = main_part + lossq_part

    # Lane-dense (8,128) output block: unmasked vector stores.
    out_ref[...] = jnp.full((1, 8, 128), partial, dtype=jnp.float32)


def lossp(gout, fout, y, W, lam, *, row_tile=None):
    """Pallas implementation of Lossp.forward. Returns a scalar (f32)."""
    N, D = gout.shape
    Nf, C = fout.shape
    assert Nf == N and y.shape == (N, C)
    if W.ndim == 1:
        W = W.reshape(N, 1)
    assert W.shape == (N, 1)

    # ---- per-generation VMEM sizing --------------------------------------
    try:
        vmem_phys = int(pltpu.get_tpu_info().vmem_capacity_bytes)
    except Exception:
        vmem_phys = 64 * 1024 * 1024                 # conservative (v7x) fallback
    vmem_limit = min(vmem_phys * 3 // 4, 100 * 1024 * 1024)
    tile_budget = int(vmem_limit * 0.6)              # for the double-buffered tiles

    def _lanes(x):
        return _round_up(max(int(x), 1), 128)

    def _working_set(t):                             # double-buffered VMEM bytes
        per_row = (_lanes(D) * gout.dtype.itemsize
                   + _lanes(C) * (fout.dtype.itemsize + y.dtype.itemsize)
                   + _lanes(1) * W.dtype.itemsize)
        return 2 * (t * per_row + 8 * 128 * 4)

    if row_tile is None:
        t = min(1024, _round_up(N, 8))
        while t > 8 and _working_set(t) > tile_budget:
            t = max(8, _round_up(t // 2, 8))
        row_tile = t
    row_tile = max(8, _round_up(min(int(row_tile), _round_up(N, 8)), 8))

    num_tiles = (N + row_tile - 1) // row_tile

    kernel = functools.partial(
        _lossp_kernel, lam=float(lam), n_rows=N, row_tile=row_tile)

    flops = 2 * N * D + 2 * N * C + 4 * N
    bytes_accessed = (N * D * gout.dtype.itemsize
                      + N * C * (fout.dtype.itemsize + y.dtype.itemsize)
                      + N * W.dtype.itemsize
                      + num_tiles * 8 * 128 * 4)

    partials = pl.pallas_call(
        kernel,
        grid=(num_tiles,),
        in_specs=[
            pl.BlockSpec((row_tile, D), lambda i: (i, 0)),   # gout
            pl.BlockSpec((row_tile, C), lambda i: (i, 0)),   # fout
            pl.BlockSpec((row_tile, C), lambda i: (i, 0)),   # y
            pl.BlockSpec((row_tile, 1), lambda i: (i, 0)),   # W
        ],
        out_specs=pl.BlockSpec((1, 8, 128), lambda i: (i, 0, 0)),
        out_shape=jax.ShapeDtypeStruct((num_tiles, 8, 128), jnp.float32),
        compiler_params=pltpu.CompilerParams(
            dimension_semantics=("parallel",),
            vmem_limit_bytes=int(vmem_limit),
        ),
        cost_estimate=pl.CostEstimate(
            flops=flops, transcendentals=N, bytes_accessed=bytes_accessed),
    )(gout, fout, y, W)

    # One scalar per tile -> final tiny reduction in plain XLA.
    return jnp.sum(partials[:, 0, 0])


def lossp_ref(gout, fout, y, W, lam):
    """Pure-JAX reference for correctness checking."""
    g = gout.astype(jnp.float32)
    lossq = -lam * jnp.sum(g * g)
    p = jnp.sum(fout.astype(jnp.float32) * y.astype(jnp.float32), axis=1)
    return jnp.sum(W.reshape(-1).astype(jnp.float32) * jnp.log(p)) + lossq


if __name__ == "__main__":
    key = jax.random.PRNGKey(0)
    lam = 0.5

    # Case 1: multi-tile grid with a ragged last tile (exercises masking + pipeline).
    k1, k2, k3, k4 = jax.random.split(key, 4)
    N, C, D = 20, 4, 32
    gout = jax.random.normal(k1, (N, D), dtype=jnp.float32)
    fout = jax.nn.softmax(jax.random.normal(k2, (N, C), dtype=jnp.float32), axis=1)
    labels = jax.random.randint(k3, (N,), 0, C)
    y = jax.nn.one_hot(labels, C, dtype=jnp.float32)
    W = jax.random.uniform(k4, (N,), dtype=jnp.float32, minval=0.1, maxval=1.0)

    out1 = jax.block_until_ready(lossp(gout, fout, y, W, lam, row_tile=8))
    ref1 = lossp_ref(gout, fout, y, W, lam)
    assert jnp.allclose(out1, ref1, rtol=2e-5, atol=1e-3), (out1, ref1)

    # Case 2: auto tile selection, exact multiple, bf16 gout (halves HBM traffic).
    k5, k6, k7, k8 = jax.random.split(jax.random.PRNGKey(1), 4)
    N2, C2, D2 = 16, 8, 64
    gout2 = jax.random.normal(k5, (N2, D2), dtype=jnp.float32).astype(jnp.bfloat16)
    fout2 = jax.nn.softmax(jax.random.normal(k6, (N2, C2), dtype=jnp.float32), axis=1)
    labels2 = jax.random.randint(k7, (N2,), 0, C2)
    y2 = jax.nn.one_hot(labels2, C2, dtype=jnp.float32)
    W2 = jax.random.uniform(k8, (N2,), dtype=jnp.float32, minval=0.1, maxval=1.0)

    out2 = jax.block_until_ready(lossp(gout2, fout2, y2, W2, lam))
    ref2 = lossp_ref(gout2, fout2, y2, W2, lam)
    assert jnp.allclose(out2, ref2, rtol=2e-5, atol=1e-3), (out2, ref2)

    print("KERNEL_OK")
</pallas_src>

<mosaic_0001>
module attributes {stable_mosaic.version = 11 : i64} {
  func.func @_lossp_kernel(%arg0: i32, %arg1: memref<8x32xf32, #tpu.memory_space<vmem>>, %arg2: memref<8x4xf32, #tpu.memory_space<vmem>>, %arg3: memref<8x4xf32, #tpu.memory_space<vmem>>, %arg4: memref<8x1xf32, #tpu.memory_space<vmem>>, %arg5: memref<1x8x128xf32, #tpu.memory_space<vmem>>) attributes {dimension_semantics = [#tpu.dimension_semantics<parallel>], iteration_bounds = array<i64: 3>, scalar_prefetch = 0 : i64, scratch_operands = 0 : i64, tpu.core_type = #tpu.core_type<tc>, window_params = [{transform_indices = @transform_0, window_bounds = array<i64: 8, 32>}, {transform_indices = @transform_1, window_bounds = array<i64: 8, 4>}, {transform_indices = @transform_2, window_bounds = array<i64: 8, 4>}, {transform_indices = @transform_3, window_bounds = array<i64: 8, 1>}, {transform_indices = @transform_4, window_bounds = array<i64: 1, 8, 128>}]} {
    %c0 = arith.constant 0 : index
    %c0_0 = arith.constant 0 : index
    %0 = vector.load %arg1[%c0, %c0_0] : memref<8x32xf32, #tpu.memory_space<vmem>>, vector<8x32xf32>
    %c0_1 = arith.constant 0 : index
    %c0_2 = arith.constant 0 : index
    %1 = vector.load %arg2[%c0_1, %c0_2] : memref<8x4xf32, #tpu.memory_space<vmem>>, vector<8x4xf32>
    %c0_3 = arith.constant 0 : index
    %c0_4 = arith.constant 0 : index
    %2 = vector.load %arg3[%c0_3, %c0_4] : memref<8x4xf32, #tpu.memory_space<vmem>>, vector<8x4xf32>
    %c0_5 = arith.constant 0 : index
    %c0_6 = arith.constant 0 : index
    %3 = vector.load %arg4[%c0_5, %c0_6] : memref<8x1xf32, #tpu.memory_space<vmem>>, vector<8x1xf32>
    %4 = arith.mulf %1, %2 : vector<8x4xf32>
    %cst = arith.constant dense<0.000000e+00> : vector<8xf32>
    %5 = vector.multi_reduction <add>, %4, %cst [1] : vector<8x4xf32> to vector<8xf32>
    %6 = vector.shape_cast %5 : vector<8xf32> to vector<8x1xf32>
    %c8_i32 = arith.constant 8 : i32
    %7 = arith.muli %arg0, %c8_i32 : i32
    %8 = tpu.iota {dimensions = array<i32: 0>} : vector<8x1xi32>
    %9 = vector.broadcast %7 : i32 to vector<8x1xi32>
    %10 = arith.addi %9, %8 : vector<8x1xi32>
    %c20_i32 = arith.constant 20 : i32
    %11 = vector.broadcast %c20_i32 : i32 to vector<8x1xi32>
    %12 = arith.cmpi slt, %10, %11 : vector<8x1xi32>
    %cst_7 = arith.constant 0.000000e+00 : f32
    %13 = vector.shape_cast %12 : vector<8x1xi1> to vector<8x1xi1>
    %14 = vector.broadcast %13 : vector<8x1xi1> to vector<8x32xi1>
    %15 = vector.broadcast %cst_7 : f32 to vector<8x32xf32>
    %16 = arith.select %14, %0, %15 : vector<8x32xi1>, vector<8x32xf32>
    %cst_8 = arith.constant 1.000000e+00 : f32
    %17 = vector.broadcast %cst_8 : f32 to vector<8x1xf32>
    %18 = arith.select %12, %6, %17 : vector<8x1xi1>, vector<8x1xf32>
    %cst_9 = arith.constant 0.000000e+00 : f32
    %19 = vector.broadcast %cst_9 : f32 to vector<8x1xf32>
    %20 = arith.select %12, %3, %19 : vector<8x1xi1>, vector<8x1xf32>
    %21 = arith.mulf %16, %16 : vector<8x32xf32>
    %22 = vector.shape_cast %21 : vector<8x32xf32> to vector<1x8x32xf32>
    %cst_10 = arith.constant dense<0.000000e+00> : vector<1xf32>
    %23 = vector.multi_reduction <add>, %22, %cst_10 [1, 2] : vector<1x8x32xf32> to vector<1xf32>
    %24 = vector.shape_cast %23 : vector<1xf32> to vector<1x1x1xf32>
    %25 = vector.extract %24[0, 0, 0] : f32 from vector<1x1x1xf32>
    %cst_11 = arith.constant -5.000000e-01 : f32
    %26 = arith.mulf %cst_11, %25 : f32
    %27 = math.log %18 : vector<8x1xf32>
    %28 = arith.mulf %20, %27 : vector<8x1xf32>
    %29 = vector.shape_cast %28 : vector<8x1xf32> to vector<1x8x1xf32>
    %cst_12 = arith.constant dense<0.000000e+00> : vector<1xf32>
    %30 = vector.multi_reduction <add>, %29, %cst_12 [1, 2] : vector<1x8x1xf32> to vector<1xf32>
    %31 = vector.shape_cast %30 : vector<1xf32> to vector<1x1x1xf32>
    %32 = vector.extract %31[0, 0, 0] : f32 from vector<1x1x1xf32>
    %33 = arith.addf %32, %26 : f32
    %34 = vector.broadcast %33 : f32 to vector<1x8x128xf32>
    %c0_13 = arith.constant 0 : index
    %c0_14 = arith.constant 0 : index
    %c0_15 = arith.constant 0 : index
    %35 = vector.load %arg5[%c0_13, %c0_14, %c0_15] : memref<1x8x128xf32, #tpu.memory_space<vmem>>, vector<1x8x128xf32>
    tpu.vector_store %arg5[%c0_13, %c0_14, %c0_15], %34 {strides = array<i32>} : memref<1x8x128xf32, #tpu.memory_space<vmem>>, vector<1x8x128xf32>,
    return
  }
  func.func @transform_0(%arg0: i32) -> (i32, i32) {
    %c0_i32 = arith.constant 0 : i32
    %c0_i32_0 = arith.constant 0 : i32
    return %arg0, %c0_i32 : i32, i32
  }
  func.func @transform_1(%arg0: i32) -> (i32, i32) {
    %c0_i32 = arith.constant 0 : i32
    %c0_i32_0 = arith.constant 0 : i32
    return %arg0, %c0_i32 : i32, i32
  }
  func.func @transform_2(%arg0: i32) -> (i32, i32) {
    %c0_i32 = arith.constant 0 : i32
    %c0_i32_0 = arith.constant 0 : i32
    return %arg0, %c0_i32 : i32, i32
  }
  func.func @transform_3(%arg0: i32) -> (i32, i32) {
    %c0_i32 = arith.constant 0 : i32
    %c0_i32_0 = arith.constant 0 : i32
    return %arg0, %c0_i32 : i32, i32
  }
  func.func @transform_4(%arg0: i32) -> (i32, i32, i32) {
    %c0_i32 = arith.constant 0 : i32
    %c0_i32_0 = arith.constant 0 : i32
    %c0_i32_1 = arith.constant 0 : i32
    return %arg0, %c0_i32, %c0_i32_0 : i32, i32, i32
  }
}

</mosaic_0001>

<bundles_post_ra>
// kernel: tpu_custom_call.1
= control target key start
LH: loop header
LB: loop body
LE: loop exit
PB: predicated region body
PF: predicated region fallthrough
CT: control target
= control target key end

     0   :  { %9 = vsyncpa [#allocation3], 0  ;;  %s651_s0 = inlined_call_operand.vmem [shape: f32[20,32], index: 0, kind: input, shape index: {}]   ;;  %s652_s1 = inlined_call_operand.vmem [shape: f32[20,4], index: 1, kind: input, shape index: {}]   ;;  %s653_s2 = inlined_call_operand.vmem [shape: f32[20,4], index: 2, kind: input, shape index: {}]   ;;  %s654_s3 = inlined_call_operand.vmem [shape: f32[20,1], index: 3, kind: input, shape index: {}]   ;;  %s655_s4 = inlined_call_operand.hbm [shape: f32[3,8,128], index: 4, kind: output, shape index: {}]  }
   0x1   :  { %11 = vsyncpa [#allocation3 + $0x1], 0  ;;  %s553_s15 = smov 0   ;;  %s555_s16 = smov 0  }
   0x2   :  { %s557_s17 = smov 0   ;;  %s559_s18 = smov 0  }
   0x3 LB: > { %s574_s19 = sadd.s32 4294967295, %s526_s18   ;;  %s405_s20 = sadd.s32 4294967294, %s526_s18   ;;  %s526_s18 = sphi %s559_s18, %s661_s18   ;;  %s522_s17 = sphi %s557_s17, %s660_s17   ;;  %s518_s16 = sphi %s555_s16, %s659_s16   ;;  %s514_s15 = sphi %s553_s15, %s658_s15  }
   0x4   : > { %s578_s21 = sadd.s32 1, %s526_s18   ;;  %s128_s22 = sadd.s32 1, %s522_s17 }
   0x5   : > { %s125_s23 = ssub.s32 %s526_s18, %s578_s21  ;;  %p138_p0 = scmp.ne.s32.totalorder %s522_s17, %s518_s16 }
   0x6   : > { %p126_p1 = scmp.eq.s32.totalorder %s125_s23, 0  ;;  %p139_p2 = scmp.eq.s32.totalorder %s574_s19, 2 }
   0x7   : > { %p144_p3 = scmp.ne.s32.totalorder %s518_s16, %s514_s15  ;;  %p145_p4 = scmp.eq.s32.totalorder %s405_s20, 2 }
   0x8   : > { %s589_s24 = scalar_select %p126_p1, %s522_s17, %s128_s22  }
   0x9   : > { %p591_p5 = por %p139_p2, %p138_p0  ;;  %p595_p6 = por %p145_p4, %p144_p3 }
   0xa   : > { %p408_p7 = scmp.ge.s32.totalorder %s526_s18, 1  ;;  %p191_p8 = scmp.lt.s32.totalorder %s526_s18, 4 }
   0xc   : > { %p192_p9 = pnand %p408_p7, %p191_p8 }
   0xd   : > { %p228_p10 = scmp.lt.s32.totalorder (!%p192_p9), %s574_s19, 2  ;;  %s414_s9 = sshll.u32 (!%p192_p9), %s574_s19, 3 }
   0xe   : > { %195 = sbr.rel (%p192_p9) target bundleno = 341 (0x155), region = 36  ;;  %s225_s22 = sand.u32 (!%p192_p9), 1, %s518_s16  }
   0xf   : > { %s409_s23 = sshll.u32 (!%p192_p9), %s225_s22, 3  ;;  %s305_s30 = scalar_lea.hbm (!%p192_p9), %s655_s4, %s414_s9 }
  0x13   : > { %s229_s27 = scalar_select %p228_p10, %s574_s19, 2  ;;  %vm249_vm0 = vcmask 31744   ;;  %v254_v4 = vlaneseq  ;;  %v256_v6 = vstv %s414_s9  ;;  %vm265_vm2 = vcmask 261120  }
  0x14   : > { %vm280_vm3 = vcmask 7168  }
  0x15   : > { %s410_s28 = sshll.u32 %s229_s27, 3  ;;  %v255_v5 = vshrl.u32 %v254_v4, 7 }
  0x16   : > { %s235_s5 = scalar_lea.vmem %s652_s1, %s410_s28  ;;  %s239_s8 = scalar_lea.vmem %s653_s2, %s410_s28 }
  0x17   : > { %v245_v0 = vld [vmem:[%s235_s5] sm:$0xff]  ;;  %v257_v7 = vadd.s32 %v256_v6, %v255_v5  ;;  %s231_s12 = scalar_lea.vmem %s651_s0, %s410_s28  ;;  %s243_s20 = scalar_lea.vmem %s654_s3, %s410_s28 }
  0x18   : > { %v246_v1 = vld [vmem:[%s239_s8] sm:$0xff]  ;;  %s227_s5 = scalar_lea.vmem [#allocation2], %s409_s23  ;;  %s309_s8 = sshll.u32 %s305_s30, 4  ;;  %s310_s8 = int_to_ptr.hbm [resolvable:$true] %s309_s8 }
  0x19   : > { %v248_v2 = vmul.f32 %v246_v1, %v245_v0  ;;  %vm258_vm1 = vcmp.lt.s32.totalorder %v257_v7, 20  ;;  %v244_v8 = vld [vmem:[%s231_s12] sm:$0xff]  ;;  %s307_s6 = sshll.u32 %s227_s5, 4  ;;  %s295_s12 = scalar_lea.sflag [#allocation3], %s225_s22  ;;  %s308_s6 = int_to_ptr.vmem [resolvable:$true] %s307_s6 }
  0x1a   : > { %v261_v9 = vsel %vm258_vm1, %v244_v8, 0.0  ;;  %v247_v14 = vld [vmem:[%s243_s20] sm:$0xff]  ;;  %s478_s13 = sshra.s32 %s310_s8, 4  ;;  %s484_s20 = scalar_lea.hbm %s655_s4, 24  ;;  %s479_s13 = int_to_ptr.hbm [resolvable:$true] %s478_s13 }
  0x1b   : > { %v250_v3 = vsel %vm249_vm0, %v248_v2, 0.0  ;;  %v264_v10 = vmul.f32 %v261_v9, %v261_v9  ;;  %v263_v16 = vsel %vm258_vm1, %v247_v14, 0.0  ;;  %s480_s14 = scalar_lea.hbm %s479_s13, 8  ;;  %p485_p0 = scmp.lt.s32.totalorder %s479_s13, %s655_s4 }
  0x1c   : > { %251 = vadd.xlane.f32.xlu0 %v250_v3  ;;  %p481_p11 = scmp.ne.s32.totalorder %s479_s13, %s480_s14  ;;  %p486_p1 = scmp.lt.s32.totalorder %s484_s20, %s480_s14 }
  0x1d   : > { %v266_v11 = vsel %vm265_vm2, %v264_v10, 0.0 }
  0x1e   : > { %p482_p12 = pnand %p481_p11, %p591_p5  ;;  %p487_p2 = por %p486_p1, %p485_p0 }
  0x20   : > { %p483_p13 = pneg %p482_p12 }
  0x22   : > { %p488_p3 = pnand %p487_p2, %p483_p13 }
  0x24   : > { %267 = vadd.xlane.f32.xlu0 %v266_v11 }
  0x8f   : > { %v252_v12 = vpop.xlane.xlu0 %251 }
  0x90   : > { %v262_v13 = vsel %vm258_vm1, %v252_v12, 1.0 }
  0x91   : > { %462 = vlog2.f32 %v262_v13 }
  0x97   : > { %v463_v15 = vpop.eup %462  ;;  %v268_v20 = vpop.xlane.xlu0 %267 }
  0x98   : > { %v278_v17 = vmul.f32 0.6931472, %v463_v15  ;;  %v269_v21 = vrot.slane %v268_v20, 4 }
  0x9a   : > { %v279_v18 = vmul.f32 %v278_v17, %v263_v16  ;;  %v270_v22 = vadd.f32 %v269_v21, %v268_v20 }
  0x9c   : > { %v281_v19 = vsel %vm280_vm3, %v279_v18, 0.0  ;;  %v271_v23 = vrot.slane %v270_v22, 2 }
  0x9d   : > { %282 = vadd.xlane.f32.xlu1 %v281_v19 }
  0x9e   : > { %v272_v24 = vadd.f32 %v271_v23, %v270_v22 }
  0xa0   : > { %v273_v25 = vrot.slane %v272_v24, 1 }
  0xa2   : > { %v274_v26 = vadd.f32 %v273_v25, %v272_v24 }
  0xa4   : > { %419 = vpush %v274_v26 }
  0xd5   : > { %s420_s27 = spop %419 }
  0xd6   : > { %s276_s7 = smul.f32 -0.5, %s420_s27 }
 0x110   : > { %v283_v27 = vpop.xlane.xlu1 %282 }
 0x111   : > { %v284_v28 = vrot.slane %v283_v27, 4 }
 0x113   : > { %v285_v29 = vadd.f32 %v284_v28, %v283_v27 }
 0x115   : > { %v286_v30 = vrot.slane %v285_v29, 2 }
 0x117   : > { %v287_v31 = vadd.f32 %v286_v30, %v285_v29 }
 0x119   : > { %v288_v32 = vrot.slane %v287_v31, 1 }
 0x11b   : > { %v289_v33 = vadd.f32 %v288_v32, %v287_v31 }
 0x11d   : > { %421 = vpush %v289_v33 }
 0x14e   : > { %s422_s10 = spop %421 }
 0x14f   : > { %s291_s11 = sadd.f32 %s422_s10, %s276_s7 }
 0x151   : > { %v292_v34 = vstv %s291_s11 }
 0x152   : > { %293 = vst [vmem:[%s227_s5] sm:$0xff] %v292_v34 }
 0x153   : > { %491 = shalt.err (!%p488_p3)
}
 0x154   : > { %423 = dma.vmem_to_hbm [thread:$0]  (%p591_p5), %s308_s6, 128, %s310_s8, %s295_s12  }
 0x155 PF: > { %p429_p4 = scmp.ge.s32.totalorder %s526_s18, 2  ;;  %s321_s22 = sand.u32 1, %s514_s15  }
 0x156   : > { %s322_s28 = scalar_lea.sflag [#allocation3], %s321_s22 }
 0x157   : > { %p426_p7 = pnand %p429_p4, %p595_p6 }
 0x159   : > { %p427_p8 = pneg %p426_p7 }
 0x15b   : > { %509 = dma.done.wait (%p427_p8), %s322_s28, 128  }
 0x15c   : > { %511 = vsyncadd (%p427_p8), %s322_s28, 4294967168  ;;  %p14_p9 = scmp.ge.s32.totalorder %s578_s21, 5   ;;  %s658_s15 = smov %s518_s16 }
 0x15d   : > { %s659_s16 = smov %s522_s17  ;;  %s660_s17 = smov %s589_s24 }
 0x15e   : > { %s661_s18 = smov %s578_s21  ;;  %16 = sbr.rel (!%p14_p9) target bundleno = 3 (0x3), region = 80 }
 0x163   :  { %328 = vsyncpa [#allocation3], 1 }
 0x164   :  { %330 = vsyncpa [#allocation3 + $0x1], 1 }

</bundles_post_ra>
